<compile_context>
chip_gen: v6e
topology: v6e:2x2x1
jax: 0.10.0
libtpu: 0.0.40
codegen_flags: <defaults>
</compile_context>

<pallas_src>
import jax
import jax.numpy as jnp
from jax.experimental import pallas as pl
from jax.experimental.pallas import tpu as pltpu


def _round_up(x, m):
    return (x + m - 1) // m * m


def _gate_kernel_packed(es_ref, out_ref, h_ref, beta_ref, m_ref, o_ref):
    """pack>1 path: each 128-lane row holds `pack` original rows side by side."""
    es = es_ref[...].astype(jnp.float32)        # (TM, W)
    outv = out_ref[...].astype(jnp.float32)     # (TM, W)
    hv = h_ref[...].astype(jnp.float32)         # (TM, W)
    beta = beta_ref[...].astype(jnp.float32)    # (2, W) lane-dense, tiled
    m_bf = m_ref[...]                           # (W, W) bf16 block-diag 0/1

    b_es = beta[0:1, :]                         # edge_sum half
    b_out = beta[1:2, :]                        # out half

    # cat([es, out], 1) @ beta  ==  per-row sum of es*b_es + out*b_out.
    weighted = es * b_es + outv * b_out         # (TM, W)   pure VPU

    # Exact f32 segmented sum + broadcast in ONE fused matmul against the
    # block-diagonal ones matrix.  `weighted` is split into three exact bf16
    # chunks so each dot is a single-pass native bf16 MXU matmul while the
    # f32-accumulated result matches a true f32 group sum (~1e-7).
    hi = weighted.astype(jnp.bfloat16)
    r1 = weighted - hi.astype(jnp.float32)
    mid = r1.astype(jnp.bfloat16)
    lo = (r1 - mid.astype(jnp.float32)).astype(jnp.bfloat16)

    logits = jnp.dot(hi, m_bf, preferred_element_type=jnp.float32)
    logits = logits + jnp.dot(mid, m_bf, preferred_element_type=jnp.float32)
    logits = logits + jnp.dot(lo, m_bf, preferred_element_type=jnp.float32)

    gate_w = jax.nn.sigmoid(logits)             # (TM, W): gate broadcast per group

    # gate*out + (1-gate)*h  ==  h + gate*(out - h)
    o_ref[...] = (hv + gate_w * (outv - hv)).astype(o_ref.dtype)


def _gate_kernel_simple(es_ref, out_ref, h_ref, beta_ref, o_ref):
    """pack==1 fallback (D doesn't divide 128): VPU multiply + XLU lane reduce."""
    es = es_ref[...].astype(jnp.float32)        # (TM, D)
    outv = out_ref[...].astype(jnp.float32)
    hv = h_ref[...].astype(jnp.float32)
    beta = beta_ref[...].astype(jnp.float32)    # (2, D)

    weighted = es * beta[0:1, :] + outv * beta[1:2, :]
    logits = jnp.sum(weighted, axis=-1, keepdims=True)      # (TM, 1)
    gate = jax.nn.sigmoid(logits)
    o_ref[...] = (hv + gate * (outv - hv)).astype(o_ref.dtype)


def gate_forward(edge_sum, out, h, beta, *, block_rows=4096):
    """edge_sum, out, h: (N, D); beta: (2*D, 1) float32 (PyTorch layout)."""
    n, d = out.shape
    assert edge_sum.shape == (n, d) and h.shape == (n, d)
    assert beta.shape == (2 * d, 1)

    out_dtype = out.dtype
    # (2*D, 1) -> (2, D): row 0 = edge_sum half, row 1 = out half (lane-dense).
    beta2 = beta.reshape(2, d).astype(jnp.float32)

    # Lane-pack `pack` consecutive rows into one 128-wide row when possible.
    if d < 128 and 128 % d == 0:
        pack = 128 // d
    else:
        pack = 1

    # Pad rows (zeros) so they pack evenly; padded rows are sliced off at the end.
    n_pad = _round_up(n, pack)
    if n_pad != n:
        padcfg = ((0, n_pad - n), (0, 0))
        edge_sum = jnp.pad(edge_sum, padcfg)
        out = jnp.pad(out, padcfg)
        h = jnp.pad(h, padcfg)

    w = pack * d
    rows = n_pad // pack
    es_p = edge_sum.reshape(rows, w)
    out_p = out.reshape(rows, w)
    h_p = h.reshape(rows, w)
    beta_w = jnp.tile(beta2, (1, pack))                      # (2, W)

    # Row-block size: big blocks to amortize per-step overhead, but force at
    # least 2 grid steps when possible so v7x's two TensorCores both work.
    bm = min(block_rows, _round_up(rows, 8))
    if rows > 8 and pl.cdiv(rows, bm) < 2:
        bm = max(8, _round_up(pl.cdiv(rows, 2), 8))
    grid = (pl.cdiv(rows, bm),)

    # VMEM budget derived from the actual block footprint (not hardcoded).
    itemsize = max(jnp.dtype(out_dtype).itemsize, 4)
    io_bytes = 2 * 4 * bm * w * itemsize        # 4 streams, double-buffered
    scratch_bytes = 8 * bm * w * 4              # intermediates / spill slack
    const_bytes = w * w * 2 + 2 * w * 4
    vmem_limit = int(min(64 * 1024 * 1024,
                         max(32 * 1024 * 1024,
                             io_bytes + scratch_bytes + const_bytes + (4 << 20))))

    row_spec = pl.BlockSpec((bm, w), lambda i: (i, 0))
    beta_spec = pl.BlockSpec((2, w), lambda i: (0, 0))

    if pack > 1:
        # Block-diagonal ones matrix (W, W): M[i, j] = 1 iff i//d == j//d.
        # Precomputed at trace time; exact in bf16 (values are 0/1).
        lane = jnp.arange(w)
        m_sel = (lane[:, None] // d == lane[None, :] // d).astype(jnp.bfloat16)
        kernel = _gate_kernel_packed
        in_specs = [row_spec, row_spec, row_spec, beta_spec,
                    pl.BlockSpec((w, w), lambda i: (0, 0))]
        args = (es_p, out_p, h_p, beta_w, m_sel)
    else:
        kernel = _gate_kernel_simple
        in_specs = [row_spec, row_spec, row_spec, beta_spec]
        args = (es_p, out_p, h_p, beta_w)

    final_p = pl.pallas_call(
        kernel,
        out_shape=jax.ShapeDtypeStruct((rows, w), out_dtype),
        grid_spec=pltpu.PrefetchScalarGridSpec(
            num_scalar_prefetch=0,
            grid=grid,
            in_specs=in_specs,
            out_specs=row_spec,
        ),
        compiler_params=pltpu.CompilerParams(
            dimension_semantics=("parallel",),
            vmem_limit_bytes=vmem_limit,
        ),
    )(*args)

    return final_p.reshape(n_pad, d)[:n]


def init_beta(key, head, output_dim, gain=1.414):
    """Deterministic xavier_normal_ equivalent for shape (2*head*output_dim, 1)."""
    fan_in = 2 * head * output_dim
    fan_out = 1
    std = gain * (2.0 / (fan_in + fan_out)) ** 0.5
    return std * jax.random.normal(key, (2 * head * output_dim, 1), jnp.float32)


def _reference(edge_sum, out, h, beta):
    g = jax.nn.sigmoid(
        jnp.matmul(jnp.concatenate([edge_sum, out], axis=1), beta,
                   precision=jax.lax.Precision.HIGHEST))
    return g * out + (1.0 - g) * h


if __name__ == "__main__":
    head = 4
    output_dim = 8
    d = head * output_dim          # 32 features

    key = jax.random.PRNGKey(0)
    k_beta, k_data = jax.random.split(key, 2)
    beta = init_beta(k_beta, head, output_dim)

    # n=128 exercises the main lane-packed path; n=126 exercises row padding
    # (126 is not a multiple of pack=4).
    for n in (128, 126):
        k_es = jax.random.fold_in(k_data, 3 * n + 0)
        k_out = jax.random.fold_in(k_data, 3 * n + 1)
        k_h = jax.random.fold_in(k_data, 3 * n + 2)
        edge_sum = jax.random.normal(k_es, (n, d), jnp.float32)
        out = jax.random.normal(k_out, (n, d), jnp.float32)
        h = jax.random.normal(k_h, (n, d), jnp.float32)

        final = jax.block_until_ready(gate_forward(edge_sum, out, h, beta))
        ref = _reference(edge_sum, out, h, beta)
        err = float(jnp.max(jnp.abs(final - ref)))
        assert final.shape == (n, d)
        assert jnp.allclose(final, ref, atol=1e-4, rtol=1e-4), err

    print("KERNEL_OK")
</pallas_src>

<mosaic_0001>
module attributes {stable_mosaic.version = 11 : i64} {
  func.func @_gate_kernel_packed(%arg0: i32, %arg1: memref<16x128xf32, #tpu.memory_space<vmem>>, %arg2: memref<16x128xf32, #tpu.memory_space<vmem>>, %arg3: memref<16x128xf32, #tpu.memory_space<vmem>>, %arg4: memref<2x128xf32, #tpu.memory_space<vmem>>, %arg5: memref<128x128xbf16, #tpu.memory_space<vmem>>, %arg6: memref<16x128xf32, #tpu.memory_space<vmem>>) attributes {dimension_semantics = [#tpu.dimension_semantics<parallel>], iteration_bounds = array<i64: 2>, scalar_prefetch = 0 : i64, scratch_operands = 0 : i64, tpu.core_type = #tpu.core_type<tc>, window_params = [{transform_indices = @transform_0, window_bounds = array<i64: 16, 128>}, {transform_indices = @transform_1, window_bounds = array<i64: 16, 128>}, {transform_indices = @transform_2, window_bounds = array<i64: 16, 128>}, {pipeline_mode = #tpu.pipeline_mode<synchronous>, transform_indices = @transform_3, window_bounds = array<i64: 2, 128>}, {pipeline_mode = #tpu.pipeline_mode<synchronous>, transform_indices = @transform_4, window_bounds = array<i64: 128, 128>}, {transform_indices = @transform_5, window_bounds = array<i64: 16, 128>}]} {
    %c0 = arith.constant 0 : index
    %c0_0 = arith.constant 0 : index
    %0 = vector.load %arg1[%c0, %c0_0] : memref<16x128xf32, #tpu.memory_space<vmem>>, vector<16x128xf32>
    %c0_1 = arith.constant 0 : index
    %c0_2 = arith.constant 0 : index
    %1 = vector.load %arg2[%c0_1, %c0_2] : memref<16x128xf32, #tpu.memory_space<vmem>>, vector<16x128xf32>
    %c0_3 = arith.constant 0 : index
    %c0_4 = arith.constant 0 : index
    %2 = vector.load %arg3[%c0_3, %c0_4] : memref<16x128xf32, #tpu.memory_space<vmem>>, vector<16x128xf32>
    %c0_5 = arith.constant 0 : index
    %c0_6 = arith.constant 0 : index
    %3 = vector.load %arg4[%c0_5, %c0_6] : memref<2x128xf32, #tpu.memory_space<vmem>>, vector<2x128xf32>
    %c0_7 = arith.constant 0 : index
    %c0_8 = arith.constant 0 : index
    %4 = vector.load %arg5[%c0_7, %c0_8] : memref<128x128xbf16, #tpu.memory_space<vmem>>, vector<128x128xbf16>
    %5 = vector.extract_strided_slice %3 {offsets = [0, 0], sizes = [1, 128], strides = [1, 1]} : vector<2x128xf32> to vector<1x128xf32>
    %6 = vector.extract_strided_slice %3 {offsets = [1, 0], sizes = [1, 128], strides = [1, 1]} : vector<2x128xf32> to vector<1x128xf32>
    %7 = vector.broadcast %5 : vector<1x128xf32> to vector<16x128xf32>
    %8 = arith.mulf %0, %7 : vector<16x128xf32>
    %9 = vector.broadcast %6 : vector<1x128xf32> to vector<16x128xf32>
    %10 = arith.mulf %1, %9 : vector<16x128xf32>
    %11 = arith.addf %8, %10 : vector<16x128xf32>
    %12 = arith.truncf %11 : vector<16x128xf32> to vector<16x128xbf16>
    %13 = arith.extf %12 : vector<16x128xbf16> to vector<16x128xf32>
    %14 = arith.subf %11, %13 : vector<16x128xf32>
    %15 = arith.truncf %14 : vector<16x128xf32> to vector<16x128xbf16>
    %16 = arith.extf %15 : vector<16x128xbf16> to vector<16x128xf32>
    %17 = arith.subf %14, %16 : vector<16x128xf32>
    %18 = arith.truncf %17 : vector<16x128xf32> to vector<16x128xbf16>
    %cst = arith.constant dense<0.000000e+00> : vector<16x128xf32>
    %19 = tpu.matmul %12, %4, %cst {dimension_numbers = #tpu.dot_dimension_numbers<[1], [0], [0], [1], [0, 0, 1, 1], [], []>} : vector<16x128xbf16>, vector<128x128xbf16>, vector<16x128xf32> -> vector<16x128xf32>
    %cst_9 = arith.constant dense<0.000000e+00> : vector<16x128xf32>
    %20 = tpu.matmul %15, %4, %cst_9 {dimension_numbers = #tpu.dot_dimension_numbers<[1], [0], [0], [1], [0, 0, 1, 1], [], []>} : vector<16x128xbf16>, vector<128x128xbf16>, vector<16x128xf32> -> vector<16x128xf32>
    %21 = arith.addf %19, %20 : vector<16x128xf32>
    %cst_10 = arith.constant dense<0.000000e+00> : vector<16x128xf32>
    %22 = tpu.matmul %18, %4, %cst_10 {dimension_numbers = #tpu.dot_dimension_numbers<[1], [0], [0], [1], [0, 0, 1, 1], [], []>} : vector<16x128xbf16>, vector<128x128xbf16>, vector<16x128xf32> -> vector<16x128xf32>
    %23 = arith.addf %21, %22 : vector<16x128xf32>
    %24 = arith.negf %23 : vector<16x128xf32>
    %25 = math.exp %24 : vector<16x128xf32>
    %cst_11 = arith.constant 1.000000e+00 : f32
    %26 = vector.broadcast %cst_11 : f32 to vector<16x128xf32>
    %27 = arith.addf %26, %25 : vector<16x128xf32>
    %28 = arith.divf %26, %27 : vector<16x128xf32>
    %29 = arith.subf %1, %2 : vector<16x128xf32>
    %30 = arith.mulf %28, %29 : vector<16x128xf32>
    %31 = arith.addf %2, %30 : vector<16x128xf32>
    %c0_12 = arith.constant 0 : index
    %c0_13 = arith.constant 0 : index
    %32 = vector.load %arg6[%c0_12, %c0_13] : memref<16x128xf32, #tpu.memory_space<vmem>>, vector<16x128xf32>
    tpu.vector_store %arg6[%c0_12, %c0_13], %31 {strides = array<i32>} : memref<16x128xf32, #tpu.memory_space<vmem>>, vector<16x128xf32>,
    return
  }
  func.func @transform_0(%arg0: i32) -> (i32, i32) {
    %c0_i32 = arith.constant 0 : i32
    %c0_i32_0 = arith.constant 0 : i32
    return %arg0, %c0_i32 : i32, i32
  }
  func.func @transform_1(%arg0: i32) -> (i32, i32) {
    %c0_i32 = arith.constant 0 : i32
    %c0_i32_0 = arith.constant 0 : i32
    return %arg0, %c0_i32 : i32, i32
  }
  func.func @transform_2(%arg0: i32) -> (i32, i32) {
    %c0_i32 = arith.constant 0 : i32
    %c0_i32_0 = arith.constant 0 : i32
    return %arg0, %c0_i32 : i32, i32
  }
  func.func @transform_3(%arg0: i32) -> (i32, i32) {
    %c0_i32 = arith.constant 0 : i32
    %c0_i32_0 = arith.constant 0 : i32
    %c0_i32_1 = arith.constant 0 : i32
    return %c0_i32, %c0_i32_0 : i32, i32
  }
  func.func @transform_4(%arg0: i32) -> (i32, i32) {
    %c0_i32 = arith.constant 0 : i32
    %c0_i32_0 = arith.constant 0 : i32
    %c0_i32_1 = arith.constant 0 : i32
    return %c0_i32, %c0_i32_0 : i32, i32
  }
  func.func @transform_5(%arg0: i32) -> (i32, i32) {
    %c0_i32 = arith.constant 0 : i32
    %c0_i32_0 = arith.constant 0 : i32
    return %arg0, %c0_i32 : i32, i32
  }
}

</mosaic_0001>

<bundles_post_ra>
// kernel: tpu_custom_call.1
= control target key start
LH: loop header
LB: loop body
LE: loop exit
PB: predicated region body
PF: predicated region fallthrough
CT: control target
= control target key end

     0   :  { %s1490_s0 = inlined_call_operand.hbm [shape: f32[32,128], index: 0, kind: input, shape index: {}]   ;;  %s1491_s1 = inlined_call_operand.hbm [shape: f32[32,128], index: 1, kind: input, shape index: {}]   ;;  %s1492_s2 = inlined_call_operand.hbm [shape: f32[32,128], index: 2, kind: input, shape index: {}]   ;;  %s1493_s3 = inlined_call_operand.vmem [shape: f32[2,128], index: 3, kind: input, shape index: {}]   ;;  %s1494_s4 = inlined_call_operand.hbm [shape: bf16[128,128], index: 4, kind: input, shape index: {}]   ;;  %s1495_s5 = inlined_call_operand.hbm [shape: f32[32,128], index: 5, kind: output, shape index: {}]  }
   0x1   :  { %1512 = sst [smem:[#allocation20_spill]] %s1491_s1 }
   0x2   :  { %1513 = sst [smem:[#allocation21_spill]] %s1495_s5 }
   0x3   :  { %10 = vsyncpa [#allocation3], 0 }
   0x4   :  { %12 = vsyncpa [#allocation3 + $0x1], 0 }
   0x5   :  { %13 = vsyncpa [#allocation6], 0 }
   0x6   :  { %15 = vsyncpa [#allocation6 + $0x1], 0 }
   0x7   :  { %16 = vsyncpa [#allocation9], 0 }
   0x8   :  { %17 = vsyncpa [#allocation4], 0 }
   0x9   :  { %19 = vsyncpa [#allocation4 + $0x1], 0  ;;  %s1164_s18 = smov 0   ;;  %s1166_s19 = smov 0  }
   0xa   :  { %s1168_s20 = smov 0   ;;  %s1170_s21 = smov 0  }
   0xb LB: > { %1514 = sst [smem:[#allocation15_spill]] %s1107_s18  ;;  %s1185_s22 = sadd.s32 1, %s1119_s21   ;;  %s1119_s21 = sphi %s1170_s21, %s1542_s21   ;;  %s1115_s20 = sphi %s1168_s20, %s1546_s20   ;;  %s1111_s19 = sphi %s1166_s19, %s1545_s19   ;;  %s1107_s18 = sphi %s1164_s18, %s1544_s18  }
   0xc   : > { %1515 = sst [smem:[#allocation16_spill]] %s1119_s21  ;;  %s32_s23 = sadd.s32 1, %s1115_s20 }
   0xd   : > { %1516 = sst [smem:[#allocation17_spill]] %s1185_s22  ;;  %s29_s24 = ssub.s32 %s1119_s21, %s1185_s22 }
   0xe   : > { %p1496_p0 = scmp.ne.s32.totalorder %s1115_s20, %s1111_s19  ;;  %p30_p1 = scmp.eq.s32.totalorder %s29_s24, 0 }
   0xf   : > { %p40_p2 = scmp.eq.s32.totalorder %s1119_s21, 0  ;;  %p877_p4 = scmp.lt.s32.totalorder %s1119_s21, 2 }
  0x10   : > { %s1196_s25 = scalar_select %p30_p1, %s1115_s20, %s32_s23  }
  0x11   : > { %p41_p5 = por %p40_p2, %p1496_p0  ;;  %s1501_s26 = sand.u32 1, %s1115_s20  }
  0x12   : > { %1517 = sst [smem:[#allocation18_spill]] %s1196_s25  ;;  %s1204_s27 = sshll.u32 %s1501_s26, 4 }
  0x13   : > { %s1207_s28 = sshll.u32 %s1119_s21, 8  ;;  %p1209_p6 = pnand %p877_p4, %p41_p5 }
  0x14   : > { %s226_s30 = sand.u32 1, %s1119_s21   ;;  %s1519_s1 = sld [smem:[#allocation20_spill]] }
  0x15   : > { %s230_s9 = scalar_lea.vmem [#allocation5], %s1204_s27  ;;  %s1223_s11 = scalar_lea.sflag [#allocation6], %s226_s30 }
  0x16   : > { %s237_s10 = sshll.u32 %s230_s9, 4  ;;  %p1229_p8 = pneg %p1209_p6  ;;  %s1221_s10 = int_to_ptr.vmem [resolvable:$true] %s237_s10 }
  0x1a   : > { %s1218_s8 = scalar_lea.hbm %s1519_s1, %s1207_s28  ;;  %s942_s16 = scalar_lea.hbm %s1519_s1, 512 }
  0x1b   : > { %s937_s12 = scalar_lea.hbm %s1218_s8, 256  ;;  %p943_p11 = scmp.lt.s32.totalorder %s1218_s8, %s1519_s1 }
  0x1c   : > { %p938_p7 = scmp.ne.s32.totalorder %s1218_s8, %s937_s12  ;;  %p944_p12 = scmp.lt.s32.totalorder %s942_s16, %s937_s12 }
  0x1e   : > { %p940_p9 = pnand %p1229_p8, %p938_p7  ;;  %p945_p13 = por %p944_p12, %p943_p11 }
  0x20   : > { %p941_p10 = pneg %p940_p9 }
  0x22   : > { %p946_p1 = pnand %p945_p13, %p941_p10 }
  0x24   : > { %949 = shalt.err (!%p946_p1)
}
  0x25   : > { %s950_s24 = scalar_lea.vmem %s1221_s10, 256  ;;  %s1121_s30 = smov [#allocation5]  }
  0x26   : > { %p951_p2 = scmp.ne.s32.totalorder %s1221_s10, %s950_s24  ;;  %s955_s6 = sshll.u32 %s1121_s30, 4  ;;  %s956_s6 = int_to_ptr.vmem [resolvable:$false] %s955_s6 }
  0x27   : > { %s957_s7 = scalar_lea.vmem %s956_s6, 512  ;;  %p958_p7 = scmp.lt.s32.totalorder %s1221_s10, %s956_s6 }
  0x28   : > { %p953_p4 = pnand %p951_p2, %p1229_p8  ;;  %p959_p9 = scmp.lt.s32.totalorder %s957_s7, %s950_s24 }
  0x2a   : > { %p954_p5 = pneg %p953_p4  ;;  %p960_p3 = por %p959_p9, %p958_p7 }
  0x2c   : > { %p961_p0 = pnand %p960_p3, %p954_p5 }
  0x2e   : > { %964 = shalt.err (!%p961_p0)
}
  0x2f   : > { %s1497_s9 = smov 128   ;;  %s1499_s12 = smov 8  }
  0x30   : > { %868 = dma.hbm_to_vmem [thread:$0]  (!%p1209_p6), %s1218_s8, 256, %s1221_s10, %s1223_s11, %s1497_s9, %s1497_s9, %s1499_s12  }
  0x31   : > { %s1256_s14 = sadd.s32 4294967295, %s1119_s21   ;;  %s721_s15 = sadd.s32 4294967294, %s1119_s21  }
  0x32   : > { %p45_p0 = scmp.ne.s32.totalorder %s1111_s19, %s1107_s18  ;;  %p1502_p3 = scmp.eq.s32.totalorder %s1256_s14, 0 }
  0x33   : > { %p163_p10 = scmp.eq.s32.totalorder %s1256_s14, 1  ;;  %p169_p11 = scmp.eq.s32.totalorder %s721_s15, 1 }
  0x34   : > { %p1265_p12 = por %p1502_p3, %p45_p0  ;;  %p722_p13 = scmp.ge.s32.totalorder %s1119_s21, 1 }
  0x35   : > { %p1522_p1 = scmp.ne.s32.totalorder %s1115_s20, %s1111_s19  ;;  %p1277_p4 = por %p169_p11, %p45_p0 }
  0x36   : > { %s1521_s16 = scalar_select %p1265_p12, 1, 0 }
  0x37   : > { %p1273_p2 = por %p163_p10, %p1522_p1  ;;  %p176_p5 = scmp.lt.s32.totalorder %s1119_s21, 3 }
  0x38   : > { %s1524_s10 = scalar_select %p1277_p4, 1, 0 }
  0x39   : > { %s1523_s8 = scalar_select %p1273_p2, 1, 0 }
  0x3a   : > { %1525 = sst [smem:[#allocation19_spill]] %s1524_s10  ;;  %p1282_p7 = pnand %p722_p13, %p176_p5 }
  0x3b   : > { %s1124_s23 = smov [#allocation8]   ;;  %s1292_s7 = scalar_lea.hbm %s1490_s0, %s1207_s28 }
  0x3c   : > { %s1526_s17 = scalar_select %p1282_p7, 1, 0 }
  0x3d   : > { %s191_s24 = sshll.u32 %s1124_s23, 4  ;;  %p858_p9 = pneg %p1282_p7  ;;  %s192_s24 = int_to_ptr.vmem [resolvable:$true] %s191_s24 }
  0x3e   : > { %s209_s9 = scalar_lea.vmem [#allocation2], %s1204_s27  ;;  %s1307_s1 = scalar_lea.hbm %s1492_s2, %s1207_s28 }
  0x3f   : > { %p1296_p0 = pnand %p858_p9, %p1502_p3  ;;  %s216_s12 = sshll.u32 %s209_s9, 4  ;;  %s1301_s12 = int_to_ptr.vmem [resolvable:$true] %s216_s12 }
  0x40   : > { %s976_s30 = scalar_lea.vmem %s192_s24, 1024  ;;  %p984_p5 = scmp.lt.s32.totalorder %s192_s24, %s192_s24 }
  0x41   : > { %p967_p10 = pneg %p1296_p0  ;;  %p977_p11 = scmp.ne.s32.totalorder %s192_s24, %s976_s30 }
  0x42   : > { %p985_p9 = scmp.lt.s32.totalorder %s976_s30, %s976_s30 }
  0x43   : > { %p979_p13 = pnand %p977_p11, %p967_p10 }
  0x44   : > { %p986_p3 = por %p985_p9, %p984_p5 }
  0x45   : > { %p980_p1 = pneg %p979_p13 }
  0x47   : > { %p987_p4 = pnand %p986_p3, %p980_p1 }
  0x49   : > { %990 = shalt.err (!%p987_p4)
}
  0x4a   : > { %s1125_s6 = smov 64   ;;  %s1126_s26 = smov 4  }
  0x4b   : > { %861 = dma.hbm_to_vmem [thread:$0]  (!%p1296_p0), %s1494_s4, 1024, %s192_s24, [#allocation9], %s1125_s6, %s1125_s6, %s1126_s26  }
  0x4c   : > { %s1528_s23 = sand.u32 1, %s1115_s20   ;;  %s991_s22 = scalar_lea.hbm %s1292_s7, 256 }
  0x4d   : > { %s206_s25 = scalar_lea.sflag [#allocation3], %s1528_s23  ;;  %p992_p10 = scmp.ne.s32.totalorder %s1292_s7, %s991_s22 }
  0x4e   : > { %s996_s10 = scalar_lea.hbm %s1490_s0, 512  ;;  %p997_p11 = scmp.lt.s32.totalorder %s1292_s7, %s1490_s0 }
  0x4f   : > { %p994_p3 = pnand %p992_p10, %p1229_p8  ;;  %p998_p13 = scmp.lt.s32.totalorder %s996_s10, %s991_s22 }
  0x51   : > { %p995_p4 = pneg %p994_p3  ;;  %p999_p1 = por %p998_p13, %p997_p11 }
  0x53   : > { %p1000_p5 = pnand %p999_p1, %p995_p4 }
  0x55   : > { %1003 = shalt.err (!%p1000_p5)
}
  0x56   : > { %s1004_s24 = scalar_lea.vmem %s1301_s12, 256  ;;  %s1127_s15 = smov [#allocation2]  }
  0x57   : > { %p1005_p0 = scmp.ne.s32.totalorder %s1301_s12, %s1004_s24  ;;  %s1009_s21 = sshll.u32 %s1127_s15, 4  ;;  %s1010_s21 = int_to_ptr.vmem [resolvable:$false] %s1009_s21 }
  0x58   : > { %s1011_s6 = scalar_lea.vmem %s1010_s21, 512  ;;  %p1012_p3 = scmp.lt.s32.totalorder %s1301_s12, %s1010_s21 }
  0x59   : > { %p1007_p9 = pnand %p1005_p0, %p1229_p8  ;;  %p1013_p2 = scmp.lt.s32.totalorder %s1011_s6, %s1004_s24 }
  0x5b   : > { %p1008_p10 = pneg %p1007_p9  ;;  %p1014_p12 = por %p1013_p2, %p1012_p3 }
  0x5d   : > { %p1015_p7 = pnand %p1014_p12, %p1008_p10 }
  0x5f   : > { %1018 = shalt.err (!%p1015_p7)
}
  0x60   : > { %s1529_s5 = smov 8   ;;  %s1530_s18 = smov 128  }
  0x61   : > { %865 = dma.hbm_to_vmem [thread:$0]  (!%p1209_p6), %s1292_s7, 256, %s1301_s12, %s206_s25, %s1530_s18, %s1530_s18, %s1529_s5  }
  0x62   : > { %s251_s22 = scalar_lea.vmem [#allocation7], %s1204_s27  ;;  %s1019_s26 = scalar_lea.hbm %s1307_s1, 256 }
  0x63   : > { %s258_s10 = sshll.u32 %s251_s22, 4  ;;  %p1020_p2 = scmp.ne.s32.totalorder %s1307_s1, %s1019_s26  ;;  %s259_s10 = int_to_ptr.vmem [resolvable:$true] %s258_s10 }
  0x64   : > { %s1024_s23 = scalar_lea.hbm %s1492_s2, 512  ;;  %p1025_p4 = scmp.lt.s32.totalorder %s1307_s1, %s1492_s2 }
  0x65   : > { %p1022_p12 = pnand %p1020_p2, %p1229_p8  ;;  %p1026_p11 = scmp.lt.s32.totalorder %s1024_s23, %s1019_s26 }
  0x67   : > { %p1023_p7 = pneg %p1022_p12  ;;  %p1027_p13 = por %p1026_p11, %p1025_p4 }
  0x69   : > { %p1028_p1 = pnand %p1027_p13, %p1023_p7 }
  0x6b   : > { %1031 = shalt.err (!%p1028_p1)
}
  0x6c   : > { %s1032_s25 = scalar_lea.vmem %s259_s10, 256  ;;  %s1128_s27 = smov [#allocation7]  }
  0x6d   : > { %p1033_p5 = scmp.ne.s32.totalorder %s259_s10, %s1032_s25  ;;  %s1037_s12 = sshll.u32 %s1128_s27, 4  ;;  %s1038_s12 = int_to_ptr.vmem [resolvable:$false] %s1037_s12 }
  0x6e   : > { %s1039_s7 = scalar_lea.vmem %s1038_s12, 512  ;;  %p1040_p10 = scmp.lt.s32.totalorder %s259_s10, %s1038_s12 }
  0x6f   : > { %p1035_p0 = pnand %p1033_p5, %p1229_p8  ;;  %p1041_p3 = scmp.lt.s32.totalorder %s1039_s7, %s1032_s25 }
  0x71   : > { %p1036_p9 = pneg %p1035_p0  ;;  %p1042_p2 = por %p1041_p3, %p1040_p10 }
  0x73   : > { %p1043_p12 = pnand %p1042_p2, %p1036_p9 }
  0x75   : > { %1046 = shalt.err (!%p1043_p12)
}
  0x76   : > { %871 = dma.hbm_to_vmem [thread:$0]  (!%p1209_p6), %s1307_s1, 256, %s259_s10, %s1223_s11, %s1530_s18, %s1530_s18, %s1529_s5  }
  0x77   : > { %p1531_p8 = scmp.ne.s32.totalorder %s1526_s17, 0 }
  0x78   : > { %s1365_s13 = sand.u32 (!%p1531_p8), 1, %s1111_s19   ;;  %p1532_p7 = scmp.ne.s32.totalorder (!%p1531_p8), %s1521_s16, 0 }
  0x79   : > { %270 = sbr.rel (%p1531_p8) target bundleno = 448 (0x1c0), region = 40  ;;  %s1368_s15 = sshll.u32 (!%p1531_p8), %s1365_s13, 4 }
  0x7a   : > { %s273_s21 = scalar_lea.sflag (!%p1531_p8), [#allocation3], %s1365_s13  ;;  %s276_s29 = scalar_lea.vmem (!%p1531_p8), [#allocation2], %s1368_s15 }
  0x7e   : > { %1090 = dma.done.wait (%p1532_p7), %s273_s21, 256  }
  0x7f   : > { %1092 = vsyncadd (%p1532_p7), %s273_s21, 4294967040  ;;  %s281_s1 = sand.u32 1, %s1256_s14   ;;  %s285_s17 = scalar_lea.vmem [#allocation5], %s1368_s15 }
  0x80   : > { %s282_s11 = scalar_lea.sflag [#allocation6], %s281_s1 }
  0x81   : > { %1094 = dma.done.wait (%p1532_p7), %s282_s11, 512  }
  0x82   : > { %1096 = vsyncadd (%p1532_p7), %s282_s11, 4294966784  ;;  %s294_s6 = scalar_lea.vmem [#allocation7], %s1368_s15  ;;  %p1533_p6 = scmp.eq.s32.totalorder %s1256_s14, 0 }
  0x84   : > { %1098 = dma.done.wait (%p1533_p6), [#allocation9], 1024   ;;  %p1534_p4 = pmov %p1533_p6 }
  0x85   : > { %v1129_v0 = vmov 0.0   ;;  %vm1130_vm0 = vmmov 0   ;;  %v363_v1 = vlaneseq  ;;  %v921_v2 = vld [vmem:[#allocation8 + $0x38] sm:$0xff]   ;;  %v922_v3 = vld [vmem:[#allocation8 + $0x30] sm:$0xff]   ;;  %v923_v5 = vld [vmem:[#allocation8 + $0x28] sm:$0xff]   ;;  %s758_s18 = sshll.u32 %s1256_s14, 8 }
  0x86   : > { %1100 = vsyncadd (%p1534_p4), [#allocation9], 4294966272  ;;  %786 = vmatprep.subr.bf16.mxu0 %v1129_v0  ;;  %806 = vmatprep.subr.bf16.mxu1 %v1129_v0  ;;  %v924_v8 = vld [vmem:[#allocation8 + $0x20] sm:$0xff]   ;;  %v341_v10 = vld [vmem:[%s276_s29 + $0x8] sm:$0xff]  ;;  %s334_s22 = scalar_lea.vmem [#allocation10], %s1368_s15  ;;  %s1535_s9 = sld [smem:[#allocation21_spill]] }
  0x87   : > { %802 = vmatprep.mubr.msk.bf16.mxu0 %vm1130_vm0, %v1129_v0  ;;  %822 = vmatprep.mubr.msk.bf16.mxu1 %vm1130_vm0, %v1129_v0  ;;  %v364_v4 = vshrl.u32 %v363_v1, 7  ;;  %v340_v9 = vld [vmem:[%s276_s29] sm:$0xff]  ;;  %v1407_v12 = vld [vmem:[%s285_s17 + $0x8] sm:$0xff]  ;;  %s595_s10 = sshll.u32 %s334_s22, 4  ;;  %s582_s30 = scalar_lea.sflag [#allocation4], %s1365_s13  ;;  %s1447_s10 = int_to_ptr.vmem [resolvable:$true] %s595_s10 }
  0x88   : > { %787 = vmatpush3.bf16.msra.mxu0 %v921_v2  ;;  %807 = vmatpush3.bf16.msra.mxu1 %v921_v2  ;;  %v1403_v11 = vld [vmem:[%s285_s17] sm:$0xff]  ;;  %v925_v20 = vld [vmem:[#allocation8 + $0x18] sm:$0xff]   ;;  %v927_v27 = vld [vmem:[#allocation8 + $0x8] sm:$0xff]   ;;  %s1047_s24 = scalar_lea.vmem %s1447_s10, 256  ;;  %p1536_p13 = scmp.ne.s32.totalorder %s1523_s8, 0 }
  0x89   : > { %788 = vmatprep.subr.bf16.mxu0 %v1129_v0  ;;  %808 = vmatprep.subr.bf16.mxu1 %v1129_v0  ;;  %v365_v6 = vsub.s32 0, %v364_v4  ;;  %v371_v7 = vsub.s32 1, %v364_v4  ;;  %v346_v13 = vld [vmem:[%s1493_s3] sm:$0x3]  ;;  %v926_v24 = vld [vmem:[#allocation8 + $0x10] sm:$0xff]   ;;  %v345_v61 = vld [vmem:[%s294_s6 + $0x8] sm:$0xff]  ;;  %p1048_p11 = scmp.ne.s32.totalorder %s1447_s10, %s1047_s24 }
  0x8a   : > { %v928_v30 = vld [vmem:[#allocation8] sm:$0xff]   ;;  %v574_v63 = vsub.f32 %v1407_v12, %v345_v61  ;;  %s1131_s14 = smov [#allocation10]  }
  0x8b   : > { %v366_v14 = vrot.slane %v346_v13, %v365_v6  ;;  %v372_v15 = vrot.slane %v346_v13, %v371_v7  ;;  %v344_v59 = vld [vmem:[%s294_s6] sm:$0xff]  ;;  %p1049_p1 = pnand %p1048_p11, %p1536_p13  ;;  %s1051_s25 = sshll.u32 %s1131_s14, 4  ;;  %s1052_s25 = int_to_ptr.vmem [resolvable:$false] %s1051_s25 }
  0x8c   : > { %789 = vmatpush3.bf16.msra.mxu0 %v922_v3  ;;  %809 = vmatpush3.bf16.msra.mxu1 %v922_v3  ;;  %v573_v60 = vsub.f32 %v1403_v11, %v344_v59  ;;  %s1445_s23 = scalar_lea.hbm %s1535_s9, %s758_s18  ;;  %s1053_s27 = scalar_lea.vmem %s1052_s25, 512 }
  0x8d   : > { %790 = vmatprep.subr.bf16.mxu0 %v1129_v0  ;;  %810 = vmatprep.subr.bf16.mxu1 %v1129_v0  ;;  %v367_v16 = vmul.f32 %v366_v14, %v340_v9  ;;  %v368_v17 = vmul.f32 %v366_v14, %v341_v10  ;;  %v373_v18 = vmul.f32 %v372_v15, %v1403_v11  ;;  %p1050_p5 = pneg %p1049_p1  ;;  %p1054_p0 = scmp.lt.s32.totalorder %s1447_s10, %s1052_s25 }
  0x8e   : > { %v374_v19 = vmul.f32 %v372_v15, %v1407_v12  ;;  %p1055_p9 = scmp.lt.s32.totalorder %s1053_s27, %s1047_s24 }
  0x8f   : > { %v375_v21 = vadd.f32 %v373_v18, %v367_v16 }
  0x90   : > { %791 = vmatpush3.bf16.msra.mxu0 %v923_v5  ;;  %811 = vmatpush3.bf16.msra.mxu1 %v923_v5  ;;  %v376_v22 = vadd.f32 %v374_v19, %v368_v17  ;;  %p1056_p10 = por %p1055_p9, %p1054_p0 }
  0x91   : > { %792 = vmatprep.subr.bf16.mxu0 %v1129_v0  ;;  %812 = vmatprep.subr.bf16.mxu1 %v1129_v0 }
  0x92   : > { %v377_v23 = vpack.c.bf16 %v376_v22, %v375_v21  ;;  %p1057_p3 = pnand %p1056_p10, %p1050_p5 }
  0x94   : > { %793 = vmatpush3.bf16.msra.mxu0 %v924_v8  ;;  %813 = vmatpush3.bf16.msra.mxu1 %v924_v8  ;;  %v378_v25 = vunpack.c.l.bf16 %v377_v23  ;;  %v379_v26 = vunpack.c.h.bf16 %v377_v23 }
  0x95   : > { %794 = vmatprep.subr.bf16.mxu0 %v1129_v0  ;;  %814 = vmatprep.subr.bf16.mxu1 %v1129_v0 }
  0x96   : > { %v380_v28 = vsub.f32 %v375_v21, %v378_v25  ;;  %v381_v29 = vsub.f32 %v376_v22, %v379_v26 }
  0x98   : > { %795 = vmatpush3.bf16.msra.mxu0 %v925_v20  ;;  %815 = vmatpush3.bf16.msra.mxu1 %v925_v20  ;;  %v382_v31 = vpack.c.bf16 %v381_v29, %v380_v28 }
  0x99   : > { %796 = vmatprep.subr.bf16.mxu0 %v1129_v0  ;;  %816 = vmatprep.subr.bf16.mxu1 %v1129_v0 }
  0x9a   : > { %v383_v32 = vunpack.c.l.bf16 %v382_v31  ;;  %v384_v33 = vunpack.c.h.bf16 %v382_v31 }
  0x9c   : > { %797 = vmatpush3.bf16.msra.mxu0 %v926_v24  ;;  %817 = vmatpush3.bf16.msra.mxu1 %v926_v24  ;;  %v385_v34 = vsub.f32 %v380_v28, %v383_v32  ;;  %v386_v35 = vsub.f32 %v381_v29, %v384_v33 }
  0x9d   : > { %798 = vmatprep.subr.bf16.mxu0 %v1129_v0  ;;  %818 = vmatprep.subr.bf16.mxu1 %v1129_v0 }
  0x9e   : > { %v387_v36 = vpack.c.bf16 %v386_v35, %v385_v34 }
  0xa0   : > { %799 = vmatpush3.bf16.msra.mxu0 %v927_v27  ;;  %819 = vmatpush3.bf16.msra.mxu1 %v927_v27 }
  0xa1   : > { %800 = vmatprep.subr.bf16.mxu0 %v1129_v0  ;;  %820 = vmatprep.subr.bf16.mxu1 %v1129_v0 }
  0xa4   : > { %801 = vmatpush3.bf16.msra.mxu0 %v928_v30  ;;  %821 = vmatpush3.bf16.msra.mxu1 %v928_v30 }
  0xa5   : > { %826 = vmatprep.subr.bf16.mxu0 %v1129_v0 }
  0xa7   : > { %803 = vmatmul.mubr.bf16.vlgmr.msra.gmra.mxu0 %v382_v31  ;;  %823 = vmatmul.mubr.bf16.vlgmr.msra.gmra.mxu1 %v377_v23 }
  0xa8   : > { %827 = vmatpush3.bf16.msra.mxu0 %v921_v2  ;;  %842 = vmatprep.mubr.msk.bf16.mxu0 %vm1130_vm0, %v1129_v0 }
  0xa9   : > { %828 = vmatprep.subr.bf16.mxu0 %v1129_v0 }
  0xac   : > { %829 = vmatpush3.bf16.msra.mxu0 %v922_v3 }
  0xad   : > { %830 = vmatprep.subr.bf16.mxu0 %v1129_v0 }
  0xb0   : > { %831 = vmatpush3.bf16.msra.mxu0 %v923_v5 }
  0xb1   : > { %832 = vmatprep.subr.bf16.mxu0 %v1129_v0 }
  0xb4   : > { %833 = vmatpush3.bf16.msra.mxu0 %v924_v8 }
  0xb5   : > { %834 = vmatprep.subr.bf16.mxu0 %v1129_v0 }
  0xb8   : > { %835 = vmatpush3.bf16.msra.mxu0 %v925_v20 }
  0xb9   : > { %836 = vmatprep.subr.bf16.mxu0 %v1129_v0 }
  0xbc   : > { %837 = vmatpush3.bf16.msra.mxu0 %v926_v24 }
  0xbd   : > { %838 = vmatprep.subr.bf16.mxu0 %v1129_v0 }
  0xc0   : > { %839 = vmatpush3.bf16.msra.mxu0 %v927_v27 }
  0xc1   : > { %840 = vmatprep.subr.bf16.mxu0 %v1129_v0 }
  0xc4   : > { %841 = vmatpush3.bf16.msra.mxu0 %v928_v30 }
  0xc7   : > { %843 = vmatmul.mubr.bf16.vlgmr.msra.gmra.mxu0 %v387_v36 }
 0x167   : > { %v470_v37 = vpop.f32.mrf.mxu0  ;;  %v511_v38 = vpop.f32.mrf.mxu1 }
 0x168   : > { %v512_v45 = vadd.f32 %v511_v38, %v470_v37 }
 0x169   : > { %v804_v39 = vpop.f32.mrf.mxu0  ;;  %v824_v40 = vpop.f32.mrf.mxu1 }
 0x16b   : > { %v473_v41 = vpop.f32.mrf.mxu0  ;;  %v514_v42 = vpop.f32.mrf.mxu1 }
 0x16c   : > { %v515_v49 = vadd.f32 %v514_v42, %v473_v41 }
 0x16d   : > { %v805_v43 = vpop.f32.mrf.mxu0  ;;  %v825_v44 = vpop.f32.mrf.mxu1 }
 0x187   : > { %v552_v46 = vpop.f32.mrf.mxu0 }
 0x188   : > { %v559_v47 = vadd.f32 %v552_v46, %v512_v45 }
 0x189   : > { %v844_v48 = vpop.f32.mrf.mxu0 }
 0x18a   : > { %v748_v50 = vmul.f32 -1.442695, %v559_v47 }
 0x18b   : > { %v555_v51 = vpop.f32.mrf.mxu0 }
 0x18c   : > { %929 = vpow2.f32 %v748_v50  ;;  %v560_v52 = vadd.f32 %v555_v51, %v515_v49 }
 0x18d   : > { %v845_v53 = vpop.f32.mrf.mxu0 }
 0x18e   : > { %v749_v54 = vmul.f32 -1.442695, %v560_v52 }
 0x190   : > { %931 = vpow2.f32 %v749_v54 }
 0x199   : > { %v930_v55 = vpop.eup %929 }
 0x19a   : > { %v567_v56 = vadd.f32 1.0, %v930_v55 }
 0x19c   : > { %933 = vrcp.f32 %v567_v56 }
 0x19d   : > { %v932_v57 = vpop.eup %931 }
 0x19e   : > { %v568_v58 = vadd.f32 1.0, %v932_v57 }
 0x1a0   : > { %935 = vrcp.f32 %v568_v58 }
 0x1a9   : > { %v934_v62 = vpop.eup %933 }
 0x1aa   : > { %v575_v0 = vmul.f32 %v934_v62, %v573_v60 }
 0x1ac   : > { %v577_v1 = vadd.f32 %v575_v0, %v344_v59 }
 0x1ad   : > { %v936_v2 = vpop.eup %935 }
 0x1ae   : > { %v576_v3 = vmul.f32 %v936_v2, %v574_v63  ;;  %579 = vst [vmem:[%s334_s22] sm:$0xff] %v577_v1 }
 0x1b0   : > { %v578_v4 = vadd.f32 %v576_v3, %v345_v61 }
 0x1b2   : > { %580 = vst [vmem:[%s334_s22 + $0x8] sm:$0xff] %v578_v4 }
 0x1b3   : > { %1060 = shalt.err (!%p1057_p3)
}
 0x1b4   : > { %s1061_s12 = scalar_lea.hbm %s1445_s23, 256  ;;  %s1065_s21 = scalar_lea.hbm %s1535_s9, 512 }
 0x1b5   : > { %p1062_p2 = scmp.ne.s32.totalorder %s1445_s23, %s1061_s12  ;;  %p1066_p7 = scmp.lt.s32.totalorder %s1445_s23, %s1535_s9 }
 0x1b6   : > { %p1067_p6 = scmp.lt.s32.totalorder %s1065_s21, %s1061_s12 }
 0x1b7   : > { %p1063_p12 = pnand %p1062_p2, %p1536_p13 }
 0x1b8   : > { %p1068_p4 = por %p1067_p6, %p1066_p7 }
 0x1b9   : > { %p1064_p8 = pneg %p1063_p12 }
 0x1bb   : > { %p1069_p11 = pnand %p1068_p4, %p1064_p8 }
 0x1bd   : > { %1072 = shalt.err (!%p1069_p11)
}
 0x1be   : > { %s1132_s11 = smov 128   ;;  %s1133_s17 = smov 8  }
 0x1bf   : > { %856 = dma.vmem_to_hbm [thread:$0]  (%p1536_p13), %s1447_s10, 256, %s1445_s23, %s582_s30, %s1132_s11, %s1132_s11, %s1133_s17  }
 0x1c0 PF: > { %s1537_s6 = sld [smem:[#allocation15_spill]] }
 0x1c1   : > { %s1538_s16 = sld [smem:[#allocation19_spill]] }
 0x1c2   : > { %s1539_s5 = sld [smem:[#allocation16_spill]] }
 0x1c6   : > { %s610_s18 = sand.u32 1, %s1537_s6  }
 0x1c7   : > { %p1540_p1 = scmp.ne.s32.totalorder %s1538_s16, 0  ;;  %s611_s22 = scalar_lea.sflag [#allocation4], %s610_s18 }
 0x1c8   : > { %p1541_p5 = scmp.ge.s32.totalorder %s1539_s5, 2 }
 0x1ca   : > { %p873_p0 = pnand %p1541_p5, %p1540_p1 }
 0x1cc   : > { %p874_p9 = pneg %p873_p0 }
 0x1ce   : > { %1102 = dma.done.wait (%p874_p9), %s611_s22, 256  }
 0x1cf   : > { %1104 = vsyncadd (%p874_p9), %s611_s22, 4294967040  ;;  %s1542_s21 = sld [smem:[#allocation17_spill]]  ;;  %s1544_s18 = smov %s1111_s19 }
 0x1d0   : > { %s1543_s26 = sld [smem:[#allocation18_spill]]  ;;  %s1545_s19 = smov %s1115_s20 }
 0x1d5   : > { %p22_p10 = scmp.ge.s32.totalorder %s1542_s21, 4  }
 0x1d6   : > { %s1546_s20 = smov %s1543_s26 }
 0x1d7   :  { %24 = sbr.rel (!%p22_p10) target bundleno = 11 (0xb), region = 113 }
 0x1dc   :  { %616 = vsyncpa [#allocation3], 1 }
 0x1dd   :  { %618 = vsyncpa [#allocation3 + $0x1], 1 }
 0x1de   :  { %619 = vsyncpa [#allocation6], 1 }
 0x1df   :  { %621 = vsyncpa [#allocation6 + $0x1], 1 }
 0x1e0   :  { %622 = vsyncpa [#allocation9], 1 }
 0x1e1   :  { %623 = vsyncpa [#allocation4], 1 }
 0x1e2   :  { %625 = vsyncpa [#allocation4 + $0x1], 1 }

</bundles_post_ra>
